<compile_context>
chip_gen: v7x
topology: tpu7x:2x2x1
jax: 0.10.0
libtpu: 0.0.40
codegen_flags: <defaults>
</compile_context>

<pallas_src>
import jax
import jax.numpy as jnp
from jax import lax
from jax.experimental import pallas as pl
from jax.experimental.pallas import tpu as pltpu


# ------------------------- attention constants ------------------------------
def _attention_constants():
    wk = jnp.array([[0.8438, 0.0458, 1.2261],
                    [1.4970, 0.7737, 1.9437],
                    [1.1215, -0.8844, 0.3796]], jnp.float32)
    wq = jnp.array([[0.688], [0.0036], [-0.2792]], jnp.float32)
    wv = jnp.array([[-2.1909, -0.3406, 0.7994],
                    [-0.5766, 0.9782, -0.3785],
                    [2.5631, 0.2146, -0.6863]], jnp.float32)
    return wk, wq, wv


# ------------------------- parameter packing (host) --------------------------
# One (8,128) f32 slab == exactly one vreg / one full-tile DMA, resident in
# VMEM for every grid step.
#   W1 (3,6): rows 0:3, lanes 0:6      b1 (6,): row 3, lanes 0:6
#   W2 (6,6): rows 0:6, lanes 8:14     b2 (6,): row 6, lanes 8:14
#   W3 (6,3): rows 0:6, lanes 16:19    b3 (3,): row 6, lanes 16:19
#   WK (3,3): rows 0:3, lanes 24:27
#   WQ (3,1): rows 0:3, lane  28
#   WV (3,3): rows 0:3, lanes 32:35
def pack_params(p):
    wk, wq, wv = _attention_constants()
    slab = jnp.zeros((8, 128), jnp.float32)
    slab = slab.at[0:3, 0:6].set(p["w1"])
    slab = slab.at[3, 0:6].set(p["b1"])
    slab = slab.at[0:6, 8:14].set(p["w2"])
    slab = slab.at[6, 8:14].set(p["b2"])
    slab = slab.at[0:6, 16:19].set(p["w3"])
    slab = slab.at[6, 16:19].set(p["b3"])
    slab = slab.at[0:3, 24:27].set(wk)
    slab = slab.at[0:3, 28:29].set(wq)
    slab = slab.at[0:3, 32:35].set(wv)
    return slab


# --------------------------------- kernel ------------------------------------
def net_attention_kernel(x_ref, p_ref, o_ref):
    x = x_ref[...]                                    # (3, 3)

    # ---- fc1: relu(x @ W1 + b1) — unrolled VPU broadcast-FMAs ----
    h = p_ref[3:4, 0:6]                               # b1 (1, 6)
    for k in range(3):
        h = h + x[:, k:k + 1] * p_ref[k:k + 1, 0:6]
    h = jnp.maximum(h, 0.0)                           # (3, 6)

    # ---- fc2 ----
    h2 = p_ref[6:7, 8:14]                             # b2 (1, 6)
    for k in range(6):
        h2 = h2 + h[:, k:k + 1] * p_ref[k:k + 1, 8:14]
    h2 = jnp.maximum(h2, 0.0)                         # (3, 6)

    # ---- fc3 ----
    h3 = p_ref[6:7, 16:19]                            # b3 (1, 3)
    for k in range(6):
        h3 = h3 + h2[:, k:k + 1] * p_ref[k:k + 1, 16:19]
    h3 = jnp.maximum(h3, 0.0)                         # (3, 3)

    # ---- attention projections (wk/wq/wv read from the resident slab) ----
    cols = [h3[:, m:m + 1] for m in range(3)]         # (3,1) each
    keys = (cols[0] * p_ref[0:1, 24:27] +
            cols[1] * p_ref[1:2, 24:27] +
            cols[2] * p_ref[2:3, 24:27])              # (3, 3)
    values = (cols[0] * p_ref[0:1, 32:35] +
              cols[1] * p_ref[1:2, 32:35] +
              cols[2] * p_ref[2:3, 32:35])            # (3, 3)
    querys = (cols[0] * p_ref[0:1, 28:29] +
              cols[1] * p_ref[1:2, 28:29] +
              cols[2] * p_ref[2:3, 28:29])            # (3, 1)

    # ---- attn[i,j] = sum_k keys[k,i] * values[k,j]  (keys.T @ values) -------
    # Pure VPU: each attn row built from (1,1)x(1,3) broadcast-FMAs, then the
    # (3,3) matrix assembled with sublane broadcasts + selects.
    rows = []
    for i in range(3):
        row_i = (keys[0:1, i:i + 1] * values[0:1, :] +
                 keys[1:2, i:i + 1] * values[1:2, :] +
                 keys[2:3, i:i + 1] * values[2:3, :])  # (1, 3)
        rows.append(jnp.broadcast_to(row_i, (3, 3)))
    r = lax.broadcasted_iota(jnp.int32, (3, 3), 0)
    attn = jnp.where(r == 0, rows[0], jnp.where(r == 1, rows[1], rows[2]))
    # neighbor[i] = attn[(i+1) % 3] — reuse the already-broadcast rows
    neighbor = jnp.where(r == 0, rows[1], jnp.where(r == 1, rows[2], rows[0]))

    # ---- fuzzy similarity: min/max quotient, 0 where max == 0 --------------
    mn = jnp.minimum(attn, neighbor)
    mx = jnp.maximum(attn, neighbor)
    s = jnp.where(mx != 0.0, mn / mx, 0.0)

    # ---- softmax over last axis ---------------------------------------------
    e = jnp.exp(s - jnp.max(s, axis=-1, keepdims=True))
    sm = e / jnp.sum(e, axis=-1, keepdims=True)

    # ---- out[i] = sum_j sm[i, j] * querys[j]  (pure VPU) --------------------
    out = (sm[:, 0:1] * querys[0:1, 0:1] +
           sm[:, 1:2] * querys[1:2, 0:1] +
           sm[:, 2:3] * querys[2:3, 0:1])             # (3, 1)

    # ---- lane-dense store: broadcast across 128 lanes -----------------------
    o_ref[...] = jnp.broadcast_to(out, (3, 128))


# -------------------------------- wrapper ------------------------------------
@jax.jit
def net_forward(x_batch, params):
    """x_batch: (B, 3, 3) float32 -> (B, 3, 1) float32."""
    B = x_batch.shape[0]
    slab = pack_params(params)
    y = pl.pallas_call(
        net_attention_kernel,
        out_shape=jax.ShapeDtypeStruct((B, 3, 128), jnp.float32),
        grid_spec=pltpu.PrefetchScalarGridSpec(
            num_scalar_prefetch=0,
            grid=(B,),
            in_specs=[
                pl.BlockSpec((None, 3, 3), lambda b: (b, 0, 0)),   # per-sample x
                pl.BlockSpec((8, 128), lambda b: (0, 0)),          # resident params
            ],
            out_specs=pl.BlockSpec((None, 3, 128), lambda b: (b, 0, 0)),
        ),
        compiler_params=pltpu.CompilerParams(
            dimension_semantics=("parallel",)),
    )(x_batch, slab)
    return y[:, :, :1]


# ------------------------------ pure-JAX ref ----------------------------------
def net_forward_ref(x, p):
    """Mirrors the PyTorch module's semantics for a single (3,3) input."""
    wk, wq, wv = _attention_constants()
    h = jax.nn.relu(x @ p["w1"] + p["b1"])
    h = jax.nn.relu(h @ p["w2"] + p["b2"])
    h = jax.nn.relu(h @ p["w3"] + p["b3"])
    keys, querys, values = h @ wk, h @ wq, h @ wv
    attn = keys.T @ values
    neighbor = jnp.roll(attn, -1, axis=0)
    mn, mx = jnp.minimum(attn, neighbor), jnp.maximum(attn, neighbor)
    s = jnp.where(mx != 0.0, mn / mx, 0.0)
    sm = jax.nn.softmax(s, axis=-1)
    return (querys[:, None] * sm.T[:, :, None]).sum(axis=0)


def init_params(key):
    ks = jax.random.split(key, 6)

    def linear(kw, kb, fan_in, fan_out):
        bound = 1.0 / (fan_in ** 0.5)
        w = jax.random.uniform(kw, (fan_in, fan_out), jnp.float32, -bound, bound)
        b = jax.random.uniform(kb, (fan_out,), jnp.float32, -bound, bound)
        return w, b

    w1, b1 = linear(ks[0], ks[1], 3, 6)
    w2, b2 = linear(ks[2], ks[3], 6, 6)
    w3, b3 = linear(ks[4], ks[5], 6, 3)
    return dict(w1=w1, b1=b1, w2=w2, b2=b2, w3=w3, b3=b3)


if __name__ == "__main__":
    key = jax.random.PRNGKey(0)
    k_x, k_p = jax.random.split(key)

    B = 4  # batch of independent (3,3) inputs; the grid amortizes launch cost
    x = jax.random.normal(k_x, (B, 3, 3), dtype=jnp.float32)
    params = init_params(k_p)

    out = jax.block_until_ready(net_forward(x, params))
    assert out.shape == (B, 3, 1)

    for b in range(B):
        ref = net_forward_ref(x[b], params)
        assert jnp.allclose(out[b], ref, atol=1e-3, rtol=1e-3), (b, out[b], ref)

    print("KERNEL_OK")
</pallas_src>

<mosaic_0001>
module attributes {stable_mosaic.version = 11 : i64} {
  func.func @net_attention_kernel(%arg0: i32, %arg1: memref<1x3x3xf32, #tpu.memory_space<vmem>>, %arg2: memref<8x128xf32, #tpu.memory_space<vmem>>, %arg3: memref<1x3x128xf32, #tpu.memory_space<vmem>>) attributes {dimension_semantics = [#tpu.dimension_semantics<parallel>], iteration_bounds = array<i64: 4>, scalar_prefetch = 0 : i64, scratch_operands = 0 : i64, tpu.core_type = #tpu.core_type<tc>, window_params = [{transform_indices = @transform_0, window_bounds = array<i64: 1, 3, 3>}, {pipeline_mode = #tpu.pipeline_mode<synchronous>, transform_indices = @transform_1, window_bounds = array<i64: 8, 128>}, {transform_indices = @transform_2, window_bounds = array<i64: 1, 3, 128>}]} {
    %c0 = arith.constant 0 : index
    %c0_0 = arith.constant 0 : index
    %c0_1 = arith.constant 0 : index
    %0 = vector.load %arg1[%c0, %c0_0, %c0_1] : memref<1x3x3xf32, #tpu.memory_space<vmem>>, vector<1x3x3xf32>
    %1 = vector.shape_cast %0 : vector<1x3x3xf32> to vector<3x3xf32>
    %c3 = arith.constant 3 : index
    %c0_2 = arith.constant 0 : index
    %2 = vector.load %arg2[%c3, %c0_2] : memref<8x128xf32, #tpu.memory_space<vmem>>, vector<1x6xf32>
    %3 = vector.extract_strided_slice %1 {offsets = [0, 0], sizes = [3, 1], strides = [1, 1]} : vector<3x3xf32> to vector<3x1xf32>
    %c0_3 = arith.constant 0 : index
    %c0_4 = arith.constant 0 : index
    %4 = vector.load %arg2[%c0_3, %c0_4] : memref<8x128xf32, #tpu.memory_space<vmem>>, vector<1x6xf32>
    %5 = vector.broadcast %3 : vector<3x1xf32> to vector<3x6xf32>
    %6 = vector.broadcast %4 : vector<1x6xf32> to vector<3x6xf32>
    %7 = arith.mulf %5, %6 : vector<3x6xf32>
    %8 = vector.broadcast %2 : vector<1x6xf32> to vector<3x6xf32>
    %9 = arith.addf %8, %7 : vector<3x6xf32>
    %10 = vector.extract_strided_slice %1 {offsets = [0, 1], sizes = [3, 1], strides = [1, 1]} : vector<3x3xf32> to vector<3x1xf32>
    %c1 = arith.constant 1 : index
    %c0_5 = arith.constant 0 : index
    %11 = vector.load %arg2[%c1, %c0_5] : memref<8x128xf32, #tpu.memory_space<vmem>>, vector<1x6xf32>
    %12 = vector.broadcast %10 : vector<3x1xf32> to vector<3x6xf32>
    %13 = vector.broadcast %11 : vector<1x6xf32> to vector<3x6xf32>
    %14 = arith.mulf %12, %13 : vector<3x6xf32>
    %15 = arith.addf %9, %14 : vector<3x6xf32>
    %16 = vector.extract_strided_slice %1 {offsets = [0, 2], sizes = [3, 1], strides = [1, 1]} : vector<3x3xf32> to vector<3x1xf32>
    %c2 = arith.constant 2 : index
    %c0_6 = arith.constant 0 : index
    %17 = vector.load %arg2[%c2, %c0_6] : memref<8x128xf32, #tpu.memory_space<vmem>>, vector<1x6xf32>
    %18 = vector.broadcast %16 : vector<3x1xf32> to vector<3x6xf32>
    %19 = vector.broadcast %17 : vector<1x6xf32> to vector<3x6xf32>
    %20 = arith.mulf %18, %19 : vector<3x6xf32>
    %21 = arith.addf %15, %20 : vector<3x6xf32>
    %cst = arith.constant 0.000000e+00 : f32
    %22 = vector.broadcast %cst : f32 to vector<3x6xf32>
    %23 = arith.maximumf %21, %22 : vector<3x6xf32>
    %c6 = arith.constant 6 : index
    %c8 = arith.constant 8 : index
    %24 = vector.load %arg2[%c6, %c8] : memref<8x128xf32, #tpu.memory_space<vmem>>, vector<1x6xf32>
    %25 = vector.extract_strided_slice %23 {offsets = [0, 0], sizes = [3, 1], strides = [1, 1]} : vector<3x6xf32> to vector<3x1xf32>
    %c0_7 = arith.constant 0 : index
    %c8_8 = arith.constant 8 : index
    %26 = vector.load %arg2[%c0_7, %c8_8] : memref<8x128xf32, #tpu.memory_space<vmem>>, vector<1x6xf32>
    %27 = vector.broadcast %25 : vector<3x1xf32> to vector<3x6xf32>
    %28 = vector.broadcast %26 : vector<1x6xf32> to vector<3x6xf32>
    %29 = arith.mulf %27, %28 : vector<3x6xf32>
    %30 = vector.broadcast %24 : vector<1x6xf32> to vector<3x6xf32>
    %31 = arith.addf %30, %29 : vector<3x6xf32>
    %32 = vector.extract_strided_slice %23 {offsets = [0, 1], sizes = [3, 1], strides = [1, 1]} : vector<3x6xf32> to vector<3x1xf32>
    %c1_9 = arith.constant 1 : index
    %c8_10 = arith.constant 8 : index
    %33 = vector.load %arg2[%c1_9, %c8_10] : memref<8x128xf32, #tpu.memory_space<vmem>>, vector<1x6xf32>
    %34 = vector.broadcast %32 : vector<3x1xf32> to vector<3x6xf32>
    %35 = vector.broadcast %33 : vector<1x6xf32> to vector<3x6xf32>
    %36 = arith.mulf %34, %35 : vector<3x6xf32>
    %37 = arith.addf %31, %36 : vector<3x6xf32>
    %38 = vector.extract_strided_slice %23 {offsets = [0, 2], sizes = [3, 1], strides = [1, 1]} : vector<3x6xf32> to vector<3x1xf32>
    %c2_11 = arith.constant 2 : index
    %c8_12 = arith.constant 8 : index
    %39 = vector.load %arg2[%c2_11, %c8_12] : memref<8x128xf32, #tpu.memory_space<vmem>>, vector<1x6xf32>
    %40 = vector.broadcast %38 : vector<3x1xf32> to vector<3x6xf32>
    %41 = vector.broadcast %39 : vector<1x6xf32> to vector<3x6xf32>
    %42 = arith.mulf %40, %41 : vector<3x6xf32>
    %43 = arith.addf %37, %42 : vector<3x6xf32>
    %44 = vector.extract_strided_slice %23 {offsets = [0, 3], sizes = [3, 1], strides = [1, 1]} : vector<3x6xf32> to vector<3x1xf32>
    %c3_13 = arith.constant 3 : index
    %c8_14 = arith.constant 8 : index
    %45 = vector.load %arg2[%c3_13, %c8_14] : memref<8x128xf32, #tpu.memory_space<vmem>>, vector<1x6xf32>
    %46 = vector.broadcast %44 : vector<3x1xf32> to vector<3x6xf32>
    %47 = vector.broadcast %45 : vector<1x6xf32> to vector<3x6xf32>
    %48 = arith.mulf %46, %47 : vector<3x6xf32>
    %49 = arith.addf %43, %48 : vector<3x6xf32>
    %50 = vector.extract_strided_slice %23 {offsets = [0, 4], sizes = [3, 1], strides = [1, 1]} : vector<3x6xf32> to vector<3x1xf32>
    %c4 = arith.constant 4 : index
    %c8_15 = arith.constant 8 : index
    %51 = vector.load %arg2[%c4, %c8_15] : memref<8x128xf32, #tpu.memory_space<vmem>>, vector<1x6xf32>
    %52 = vector.broadcast %50 : vector<3x1xf32> to vector<3x6xf32>
    %53 = vector.broadcast %51 : vector<1x6xf32> to vector<3x6xf32>
    %54 = arith.mulf %52, %53 : vector<3x6xf32>
    %55 = arith.addf %49, %54 : vector<3x6xf32>
    %56 = vector.extract_strided_slice %23 {offsets = [0, 5], sizes = [3, 1], strides = [1, 1]} : vector<3x6xf32> to vector<3x1xf32>
    %c5 = arith.constant 5 : index
    %c8_16 = arith.constant 8 : index
    %57 = vector.load %arg2[%c5, %c8_16] : memref<8x128xf32, #tpu.memory_space<vmem>>, vector<1x6xf32>
    %58 = vector.broadcast %56 : vector<3x1xf32> to vector<3x6xf32>
    %59 = vector.broadcast %57 : vector<1x6xf32> to vector<3x6xf32>
    %60 = arith.mulf %58, %59 : vector<3x6xf32>
    %61 = arith.addf %55, %60 : vector<3x6xf32>
    %cst_17 = arith.constant 0.000000e+00 : f32
    %62 = vector.broadcast %cst_17 : f32 to vector<3x6xf32>
    %63 = arith.maximumf %61, %62 : vector<3x6xf32>
    %c6_18 = arith.constant 6 : index
    %c16 = arith.constant 16 : index
    %64 = vector.load %arg2[%c6_18, %c16] : memref<8x128xf32, #tpu.memory_space<vmem>>, vector<1x3xf32>
    %65 = vector.extract_strided_slice %63 {offsets = [0, 0], sizes = [3, 1], strides = [1, 1]} : vector<3x6xf32> to vector<3x1xf32>
    %c0_19 = arith.constant 0 : index
    %c16_20 = arith.constant 16 : index
    %66 = vector.load %arg2[%c0_19, %c16_20] : memref<8x128xf32, #tpu.memory_space<vmem>>, vector<1x3xf32>
    %67 = vector.broadcast %65 : vector<3x1xf32> to vector<3x3xf32>
    %68 = vector.broadcast %66 : vector<1x3xf32> to vector<3x3xf32>
    %69 = arith.mulf %67, %68 : vector<3x3xf32>
    %70 = vector.broadcast %64 : vector<1x3xf32> to vector<3x3xf32>
    %71 = arith.addf %70, %69 : vector<3x3xf32>
    %72 = vector.extract_strided_slice %63 {offsets = [0, 1], sizes = [3, 1], strides = [1, 1]} : vector<3x6xf32> to vector<3x1xf32>
    %c1_21 = arith.constant 1 : index
    %c16_22 = arith.constant 16 : index
    %73 = vector.load %arg2[%c1_21, %c16_22] : memref<8x128xf32, #tpu.memory_space<vmem>>, vector<1x3xf32>
    %74 = vector.broadcast %72 : vector<3x1xf32> to vector<3x3xf32>
    %75 = vector.broadcast %73 : vector<1x3xf32> to vector<3x3xf32>
    %76 = arith.mulf %74, %75 : vector<3x3xf32>
    %77 = arith.addf %71, %76 : vector<3x3xf32>
    %78 = vector.extract_strided_slice %63 {offsets = [0, 2], sizes = [3, 1], strides = [1, 1]} : vector<3x6xf32> to vector<3x1xf32>
    %c2_23 = arith.constant 2 : index
    %c16_24 = arith.constant 16 : index
    %79 = vector.load %arg2[%c2_23, %c16_24] : memref<8x128xf32, #tpu.memory_space<vmem>>, vector<1x3xf32>
    %80 = vector.broadcast %78 : vector<3x1xf32> to vector<3x3xf32>
    %81 = vector.broadcast %79 : vector<1x3xf32> to vector<3x3xf32>
    %82 = arith.mulf %80, %81 : vector<3x3xf32>
    %83 = arith.addf %77, %82 : vector<3x3xf32>
    %84 = vector.extract_strided_slice %63 {offsets = [0, 3], sizes = [3, 1], strides = [1, 1]} : vector<3x6xf32> to vector<3x1xf32>
    %c3_25 = arith.constant 3 : index
    %c16_26 = arith.constant 16 : index
    %85 = vector.load %arg2[%c3_25, %c16_26] : memref<8x128xf32, #tpu.memory_space<vmem>>, vector<1x3xf32>
    %86 = vector.broadcast %84 : vector<3x1xf32> to vector<3x3xf32>
    %87 = vector.broadcast %85 : vector<1x3xf32> to vector<3x3xf32>
    %88 = arith.mulf %86, %87 : vector<3x3xf32>
    %89 = arith.addf %83, %88 : vector<3x3xf32>
    %90 = vector.extract_strided_slice %63 {offsets = [0, 4], sizes = [3, 1], strides = [1, 1]} : vector<3x6xf32> to vector<3x1xf32>
    %c4_27 = arith.constant 4 : index
    %c16_28 = arith.constant 16 : index
    %91 = vector.load %arg2[%c4_27, %c16_28] : memref<8x128xf32, #tpu.memory_space<vmem>>, vector<1x3xf32>
    %92 = vector.broadcast %90 : vector<3x1xf32> to vector<3x3xf32>
    %93 = vector.broadcast %91 : vector<1x3xf32> to vector<3x3xf32>
    %94 = arith.mulf %92, %93 : vector<3x3xf32>
    %95 = arith.addf %89, %94 : vector<3x3xf32>
    %96 = vector.extract_strided_slice %63 {offsets = [0, 5], sizes = [3, 1], strides = [1, 1]} : vector<3x6xf32> to vector<3x1xf32>
    %c5_29 = arith.constant 5 : index
    %c16_30 = arith.constant 16 : index
    %97 = vector.load %arg2[%c5_29, %c16_30] : memref<8x128xf32, #tpu.memory_space<vmem>>, vector<1x3xf32>
    %98 = vector.broadcast %96 : vector<3x1xf32> to vector<3x3xf32>
    %99 = vector.broadcast %97 : vector<1x3xf32> to vector<3x3xf32>
    %100 = arith.mulf %98, %99 : vector<3x3xf32>
    %101 = arith.addf %95, %100 : vector<3x3xf32>
    %cst_31 = arith.constant 0.000000e+00 : f32
    %102 = vector.broadcast %cst_31 : f32 to vector<3x3xf32>
    %103 = arith.maximumf %101, %102 : vector<3x3xf32>
    %104 = vector.extract_strided_slice %103 {offsets = [0, 0], sizes = [3, 1], strides = [1, 1]} : vector<3x3xf32> to vector<3x1xf32>
    %105 = vector.extract_strided_slice %103 {offsets = [0, 1], sizes = [3, 1], strides = [1, 1]} : vector<3x3xf32> to vector<3x1xf32>
    %106 = vector.extract_strided_slice %103 {offsets = [0, 2], sizes = [3, 1], strides = [1, 1]} : vector<3x3xf32> to vector<3x1xf32>
    %c0_32 = arith.constant 0 : index
    %c24 = arith.constant 24 : index
    %107 = vector.load %arg2[%c0_32, %c24] : memref<8x128xf32, #tpu.memory_space<vmem>>, vector<1x3xf32>
    %108 = vector.broadcast %104 : vector<3x1xf32> to vector<3x3xf32>
    %109 = vector.broadcast %107 : vector<1x3xf32> to vector<3x3xf32>
    %110 = arith.mulf %108, %109 : vector<3x3xf32>
    %c1_33 = arith.constant 1 : index
    %c24_34 = arith.constant 24 : index
    %111 = vector.load %arg2[%c1_33, %c24_34] : memref<8x128xf32, #tpu.memory_space<vmem>>, vector<1x3xf32>
    %112 = vector.broadcast %105 : vector<3x1xf32> to vector<3x3xf32>
    %113 = vector.broadcast %111 : vector<1x3xf32> to vector<3x3xf32>
    %114 = arith.mulf %112, %113 : vector<3x3xf32>
    %115 = arith.addf %110, %114 : vector<3x3xf32>
    %c2_35 = arith.constant 2 : index
    %c24_36 = arith.constant 24 : index
    %116 = vector.load %arg2[%c2_35, %c24_36] : memref<8x128xf32, #tpu.memory_space<vmem>>, vector<1x3xf32>
    %117 = vector.broadcast %106 : vector<3x1xf32> to vector<3x3xf32>
    %118 = vector.broadcast %116 : vector<1x3xf32> to vector<3x3xf32>
    %119 = arith.mulf %117, %118 : vector<3x3xf32>
    %120 = arith.addf %115, %119 : vector<3x3xf32>
    %c0_37 = arith.constant 0 : index
    %c32 = arith.constant 32 : index
    %121 = vector.load %arg2[%c0_37, %c32] : memref<8x128xf32, #tpu.memory_space<vmem>>, vector<1x3xf32>
    %122 = vector.broadcast %104 : vector<3x1xf32> to vector<3x3xf32>
    %123 = vector.broadcast %121 : vector<1x3xf32> to vector<3x3xf32>
    %124 = arith.mulf %122, %123 : vector<3x3xf32>
    %c1_38 = arith.constant 1 : index
    %c32_39 = arith.constant 32 : index
    %125 = vector.load %arg2[%c1_38, %c32_39] : memref<8x128xf32, #tpu.memory_space<vmem>>, vector<1x3xf32>
    %126 = vector.broadcast %105 : vector<3x1xf32> to vector<3x3xf32>
    %127 = vector.broadcast %125 : vector<1x3xf32> to vector<3x3xf32>
    %128 = arith.mulf %126, %127 : vector<3x3xf32>
    %129 = arith.addf %124, %128 : vector<3x3xf32>
    %c2_40 = arith.constant 2 : index
    %c32_41 = arith.constant 32 : index
    %130 = vector.load %arg2[%c2_40, %c32_41] : memref<8x128xf32, #tpu.memory_space<vmem>>, vector<1x3xf32>
    %131 = vector.broadcast %106 : vector<3x1xf32> to vector<3x3xf32>
    %132 = vector.broadcast %130 : vector<1x3xf32> to vector<3x3xf32>
    %133 = arith.mulf %131, %132 : vector<3x3xf32>
    %134 = arith.addf %129, %133 : vector<3x3xf32>
    %c0_42 = arith.constant 0 : index
    %c28 = arith.constant 28 : index
    %135 = vector.load %arg2[%c0_42, %c28] : memref<8x128xf32, #tpu.memory_space<vmem>>, vector<1x1xf32>
    %136 = vector.broadcast %135 : vector<1x1xf32> to vector<3x1xf32>
    %137 = arith.mulf %104, %136 : vector<3x1xf32>
    %c1_43 = arith.constant 1 : index
    %c28_44 = arith.constant 28 : index
    %138 = vector.load %arg2[%c1_43, %c28_44] : memref<8x128xf32, #tpu.memory_space<vmem>>, vector<1x1xf32>
    %139 = vector.broadcast %138 : vector<1x1xf32> to vector<3x1xf32>
    %140 = arith.mulf %105, %139 : vector<3x1xf32>
    %141 = arith.addf %137, %140 : vector<3x1xf32>
    %c2_45 = arith.constant 2 : index
    %c28_46 = arith.constant 28 : index
    %142 = vector.load %arg2[%c2_45, %c28_46] : memref<8x128xf32, #tpu.memory_space<vmem>>, vector<1x1xf32>
    %143 = vector.broadcast %142 : vector<1x1xf32> to vector<3x1xf32>
    %144 = arith.mulf %106, %143 : vector<3x1xf32>
    %145 = arith.addf %141, %144 : vector<3x1xf32>
    %146 = vector.extract_strided_slice %120 {offsets = [0, 0], sizes = [1, 1], strides = [1, 1]} : vector<3x3xf32> to vector<1x1xf32>
    %147 = vector.extract_strided_slice %134 {offsets = [0, 0], sizes = [1, 3], strides = [1, 1]} : vector<3x3xf32> to vector<1x3xf32>
    %148 = vector.broadcast %146 : vector<1x1xf32> to vector<1x3xf32>
    %149 = arith.mulf %148, %147 : vector<1x3xf32>
    %150 = vector.extract_strided_slice %120 {offsets = [1, 0], sizes = [1, 1], strides = [1, 1]} : vector<3x3xf32> to vector<1x1xf32>
    %151 = vector.extract_strided_slice %134 {offsets = [1, 0], sizes = [1, 3], strides = [1, 1]} : vector<3x3xf32> to vector<1x3xf32>
    %152 = vector.broadcast %150 : vector<1x1xf32> to vector<1x3xf32>
    %153 = arith.mulf %152, %151 : vector<1x3xf32>
    %154 = arith.addf %149, %153 : vector<1x3xf32>
    %155 = vector.extract_strided_slice %120 {offsets = [2, 0], sizes = [1, 1], strides = [1, 1]} : vector<3x3xf32> to vector<1x1xf32>
    %156 = vector.extract_strided_slice %134 {offsets = [2, 0], sizes = [1, 3], strides = [1, 1]} : vector<3x3xf32> to vector<1x3xf32>
    %157 = vector.broadcast %155 : vector<1x1xf32> to vector<1x3xf32>
    %158 = arith.mulf %157, %156 : vector<1x3xf32>
    %159 = arith.addf %154, %158 : vector<1x3xf32>
    %160 = vector.shape_cast %159 : vector<1x3xf32> to vector<1x3xf32>
    %161 = vector.broadcast %160 : vector<1x3xf32> to vector<3x3xf32>
    %162 = vector.extract_strided_slice %120 {offsets = [0, 1], sizes = [1, 1], strides = [1, 1]} : vector<3x3xf32> to vector<1x1xf32>
    %163 = vector.extract_strided_slice %134 {offsets = [0, 0], sizes = [1, 3], strides = [1, 1]} : vector<3x3xf32> to vector<1x3xf32>
    %164 = vector.broadcast %162 : vector<1x1xf32> to vector<1x3xf32>
    %165 = arith.mulf %164, %163 : vector<1x3xf32>
    %166 = vector.extract_strided_slice %120 {offsets = [1, 1], sizes = [1, 1], strides = [1, 1]} : vector<3x3xf32> to vector<1x1xf32>
    %167 = vector.extract_strided_slice %134 {offsets = [1, 0], sizes = [1, 3], strides = [1, 1]} : vector<3x3xf32> to vector<1x3xf32>
    %168 = vector.broadcast %166 : vector<1x1xf32> to vector<1x3xf32>
    %169 = arith.mulf %168, %167 : vector<1x3xf32>
    %170 = arith.addf %165, %169 : vector<1x3xf32>
    %171 = vector.extract_strided_slice %120 {offsets = [2, 1], sizes = [1, 1], strides = [1, 1]} : vector<3x3xf32> to vector<1x1xf32>
    %172 = vector.extract_strided_slice %134 {offsets = [2, 0], sizes = [1, 3], strides = [1, 1]} : vector<3x3xf32> to vector<1x3xf32>
    %173 = vector.broadcast %171 : vector<1x1xf32> to vector<1x3xf32>
    %174 = arith.mulf %173, %172 : vector<1x3xf32>
    %175 = arith.addf %170, %174 : vector<1x3xf32>
    %176 = vector.shape_cast %175 : vector<1x3xf32> to vector<1x3xf32>
    %177 = vector.broadcast %176 : vector<1x3xf32> to vector<3x3xf32>
    %178 = vector.extract_strided_slice %120 {offsets = [0, 2], sizes = [1, 1], strides = [1, 1]} : vector<3x3xf32> to vector<1x1xf32>
    %179 = vector.extract_strided_slice %134 {offsets = [0, 0], sizes = [1, 3], strides = [1, 1]} : vector<3x3xf32> to vector<1x3xf32>
    %180 = vector.broadcast %178 : vector<1x1xf32> to vector<1x3xf32>
    %181 = arith.mulf %180, %179 : vector<1x3xf32>
    %182 = vector.extract_strided_slice %120 {offsets = [1, 2], sizes = [1, 1], strides = [1, 1]} : vector<3x3xf32> to vector<1x1xf32>
    %183 = vector.extract_strided_slice %134 {offsets = [1, 0], sizes = [1, 3], strides = [1, 1]} : vector<3x3xf32> to vector<1x3xf32>
    %184 = vector.broadcast %182 : vector<1x1xf32> to vector<1x3xf32>
    %185 = arith.mulf %184, %183 : vector<1x3xf32>
    %186 = arith.addf %181, %185 : vector<1x3xf32>
    %187 = vector.extract_strided_slice %120 {offsets = [2, 2], sizes = [1, 1], strides = [1, 1]} : vector<3x3xf32> to vector<1x1xf32>
    %188 = vector.extract_strided_slice %134 {offsets = [2, 0], sizes = [1, 3], strides = [1, 1]} : vector<3x3xf32> to vector<1x3xf32>
    %189 = vector.broadcast %187 : vector<1x1xf32> to vector<1x3xf32>
    %190 = arith.mulf %189, %188 : vector<1x3xf32>
    %191 = arith.addf %186, %190 : vector<1x3xf32>
    %192 = vector.shape_cast %191 : vector<1x3xf32> to vector<1x3xf32>
    %193 = vector.broadcast %192 : vector<1x3xf32> to vector<3x3xf32>
    %194 = tpu.iota {dimensions = array<i32: 0>} : vector<3x3xi32>
    %c0_i32 = arith.constant 0 : i32
    %195 = vector.broadcast %c0_i32 : i32 to vector<3x3xi32>
    %196 = arith.cmpi eq, %194, %195 : vector<3x3xi32>
    %c1_i32 = arith.constant 1 : i32
    %197 = vector.broadcast %c1_i32 : i32 to vector<3x3xi32>
    %198 = arith.cmpi eq, %194, %197 : vector<3x3xi32>
    %199 = arith.select %198, %177, %193 : vector<3x3xi1>, vector<3x3xf32>
    %200 = arith.select %196, %161, %199 : vector<3x3xi1>, vector<3x3xf32>
    %c0_i32_47 = arith.constant 0 : i32
    %201 = vector.broadcast %c0_i32_47 : i32 to vector<3x3xi32>
    %202 = arith.cmpi eq, %194, %201 : vector<3x3xi32>
    %c1_i32_48 = arith.constant 1 : i32
    %203 = vector.broadcast %c1_i32_48 : i32 to vector<3x3xi32>
    %204 = arith.cmpi eq, %194, %203 : vector<3x3xi32>
    %205 = arith.select %204, %193, %161 : vector<3x3xi1>, vector<3x3xf32>
    %206 = arith.select %202, %177, %205 : vector<3x3xi1>, vector<3x3xf32>
    %207 = arith.minimumf %200, %206 : vector<3x3xf32>
    %208 = arith.maximumf %200, %206 : vector<3x3xf32>
    %cst_49 = arith.constant 0.000000e+00 : f32
    %209 = vector.broadcast %cst_49 : f32 to vector<3x3xf32>
    %210 = arith.cmpf one, %208, %209 : vector<3x3xf32>
    %211 = arith.divf %207, %208 : vector<3x3xf32>
    %cst_50 = arith.constant 0.000000e+00 : f32
    %212 = vector.broadcast %cst_50 : f32 to vector<3x3xf32>
    %213 = arith.select %210, %211, %212 : vector<3x3xi1>, vector<3x3xf32>
    %cst_51 = arith.constant dense<0xFF800000> : vector<3xf32>
    %214 = vector.multi_reduction <maximumf>, %213, %cst_51 [1] : vector<3x3xf32> to vector<3xf32>
    %215 = vector.shape_cast %214 : vector<3xf32> to vector<3x1xf32>
    %216 = vector.broadcast %215 : vector<3x1xf32> to vector<3x3xf32>
    %217 = arith.subf %213, %216 : vector<3x3xf32>
    %218 = math.exp %217 : vector<3x3xf32>
    %cst_52 = arith.constant dense<0.000000e+00> : vector<3xf32>
    %219 = vector.multi_reduction <add>, %218, %cst_52 [1] : vector<3x3xf32> to vector<3xf32>
    %220 = vector.shape_cast %219 : vector<3xf32> to vector<3x1xf32>
    %221 = vector.broadcast %220 : vector<3x1xf32> to vector<3x3xf32>
    %222 = arith.divf %218, %221 : vector<3x3xf32>
    %223 = vector.extract_strided_slice %222 {offsets = [0, 0], sizes = [3, 1], strides = [1, 1]} : vector<3x3xf32> to vector<3x1xf32>
    %224 = vector.extract_strided_slice %145 {offsets = [0, 0], sizes = [1, 1], strides = [1, 1]} : vector<3x1xf32> to vector<1x1xf32>
    %225 = vector.broadcast %224 : vector<1x1xf32> to vector<3x1xf32>
    %226 = arith.mulf %223, %225 : vector<3x1xf32>
    %227 = vector.extract_strided_slice %222 {offsets = [0, 1], sizes = [3, 1], strides = [1, 1]} : vector<3x3xf32> to vector<3x1xf32>
    %228 = vector.extract_strided_slice %145 {offsets = [1, 0], sizes = [1, 1], strides = [1, 1]} : vector<3x1xf32> to vector<1x1xf32>
    %229 = vector.broadcast %228 : vector<1x1xf32> to vector<3x1xf32>
    %230 = arith.mulf %227, %229 : vector<3x1xf32>
    %231 = arith.addf %226, %230 : vector<3x1xf32>
    %232 = vector.extract_strided_slice %222 {offsets = [0, 2], sizes = [3, 1], strides = [1, 1]} : vector<3x3xf32> to vector<3x1xf32>
    %233 = vector.extract_strided_slice %145 {offsets = [2, 0], sizes = [1, 1], strides = [1, 1]} : vector<3x1xf32> to vector<1x1xf32>
    %234 = vector.broadcast %233 : vector<1x1xf32> to vector<3x1xf32>
    %235 = arith.mulf %232, %234 : vector<3x1xf32>
    %236 = arith.addf %231, %235 : vector<3x1xf32>
    %237 = vector.shape_cast %236 : vector<3x1xf32> to vector<3x1xf32>
    %238 = vector.broadcast %237 : vector<3x1xf32> to vector<3x128xf32>
    %c0_53 = arith.constant 0 : index
    %c0_54 = arith.constant 0 : index
    %c0_55 = arith.constant 0 : index
    %239 = vector.load %arg3[%c0_53, %c0_54, %c0_55] : memref<1x3x128xf32, #tpu.memory_space<vmem>>, vector<1x3x128xf32>
    %240 = vector.shape_cast %239 : vector<1x3x128xf32> to vector<3x128xf32>
    %241 = vector.shape_cast %238 : vector<3x128xf32> to vector<1x3x128xf32>
    tpu.vector_store %arg3[%c0_53, %c0_54, %c0_55], %241 {strides = array<i32>} : memref<1x3x128xf32, #tpu.memory_space<vmem>>, vector<1x3x128xf32>,
    return
  }
  func.func @transform_0(%arg0: i32) -> (i32, i32, i32) {
    %c0_i32 = arith.constant 0 : i32
    %c0_i32_0 = arith.constant 0 : i32
    %c0_i32_1 = arith.constant 0 : i32
    return %arg0, %c0_i32, %c0_i32_0 : i32, i32, i32
  }
  func.func @transform_1(%arg0: i32) -> (i32, i32) {
    %c0_i32 = arith.constant 0 : i32
    %c0_i32_0 = arith.constant 0 : i32
    %c0_i32_1 = arith.constant 0 : i32
    return %c0_i32, %c0_i32_0 : i32, i32
  }
  func.func @transform_2(%arg0: i32) -> (i32, i32, i32) {
    %c0_i32 = arith.constant 0 : i32
    %c0_i32_0 = arith.constant 0 : i32
    %c0_i32_1 = arith.constant 0 : i32
    return %arg0, %c0_i32, %c0_i32_0 : i32, i32, i32
  }
}

</mosaic_0001>

<bundles_post_ra>
// kernel: net_forward.1
= control target key start
LH: loop header
LB: loop body
LE: loop exit
PB: predicated region body
PF: predicated region fallthrough
CT: control target
= control target key end

     0   :  { %s622_s9 = smov 0   ;;  %s718_s0 = inlined_call_operand.vmem [shape: f32[4,3,3], index: 0, kind: input, shape index: {}]   ;;  %s719_s1 = inlined_call_operand.vmem [shape: f32[8,128], index: 1, kind: input, shape index: {}]   ;;  %s720_s2 = inlined_call_operand.vmem [shape: f32[4,3,128], index: 2, kind: output, shape index: {}]  }
   0x1 LB: > { %s490_s10 = sadd.s32 4294967295, %s577_s9   ;;  %p494_p0 = scmp.ge.s32.totalorder %s577_s9, 1  ;;  %s577_s9 = sphi %s622_s9, %s12_s9  }
   0x2   : > { %p111_p1 = scmp.lt.s32.totalorder %s577_s9, 5 }
   0x4   : > { %p112_p2 = pnand %p494_p0, %p111_p1 }
   0x5   : > { %p131_p3 = scmp.lt.s32.totalorder (!%p112_p2), %s490_s10, 3  ;;  %v579_v0 = vmov (!%p112_p2), 0   ;;  %v580_v1 = vmov (!%p112_p2), 2   ;;  %v581_v3 = vmov (!%p112_p2), 1   ;;  %v641_v4 = vld [vmem:[%s719_s1] ss:$0 sm:$0xff] (!%p112_p2) }
   0x6   : > { %115 = sbr.rel (%p112_p2) target bundleno = 1439 (0x59f), region = 28  ;;  %542 = vset.pattern.permute.xlu0 (!%p112_p2), %v579_v0  ;;  %544 = vset.pattern.permute.xlu1 (!%p112_p2), %v580_v1  ;;  %v647_v7 = vld [vmem:[%s719_s1 + $0x3] ss:$0 sm:$0xff] (!%p112_p2)  ;;  %v652_v8 = vld [vmem:[%s719_s1 + $0x1] ss:$0 sm:$0xff] (!%p112_p2)  ;;  %v582_v18 = vmov (!%p112_p2), 5  }
   0x7   : > { %v657_v9 = vld [vmem:[%s719_s1 + $0x2] ss:$0 sm:$0xff] (!%p112_p2)  ;;  %v583_v19 = vmov (!%p112_p2), 3   ;;  %v584_v20 = vmov (!%p112_p2), 4   ;;  %v585_v21 = vmov (!%p112_p2), 10   ;;  %v586_v22 = vmov (!%p112_p2), 8  }
   0x8   : > { %v501_v25 = vld [vmem:[%s719_s1 + $0x6] ss:$0 sm:$0xff] (!%p112_p2)  ;;  %v502_v35 = vld [vmem:[%s719_s1 + $0x4] ss:$0 sm:$0xff] (!%p112_p2)  ;;  %v503_v36 = vld [vmem:[%s719_s1 + $0x5] ss:$0 sm:$0xff] (!%p112_p2) }
   0x9   : > { %v587_v45 = vmov (!%p112_p2), 13   ;;  %v588_v46 = vmov (!%p112_p2), 9   ;;  %v589_v47 = vmov (!%p112_p2), 11   ;;  %v590_v48 = vmov (!%p112_p2), 12   ;;  %s597_s29 = smov (!%p112_p2), 117   ;;  %s598_s30 = smov (!%p112_p2), 118  }
   0xa   : > { %v591_v49 = vmov (!%p112_p2), 18   ;;  %v592_v50 = vmov (!%p112_p2), 16   ;;  %vm377_vm2 = vcmask (!%p112_p2), 280832   ;;  %s599_s3 = smov (!%p112_p2), 96   ;;  %s600_s4 = smov (!%p112_p2), 116   ;;  %vm388_vm4 = vcmask (!%p112_p2), 18432  }
   0xb   : > { %s601_s5 = smov (!%p112_p2), 127   ;;  %s602_s6 = smov (!%p112_p2), 126  }
   0xc   : > { %s603_s7 = smov (!%p112_p2), 17   ;;  %s604_s8 = smov (!%p112_p2), 18  }
   0xd   : > { %s722_s10 = smov (!%p131_p3, %s490_s10), 3  ;;  %s605_s12 = smov 16  }
   0xe   : > { %s495_s11 = sshll.u32 %s722_s10, 2 }
   0xf   : > { %s134_s14 = scalar_lea.vmem %s718_s0, %s495_s11  ;;  %s138_s15 = scalar_lea.vmem %s720_s2, %s495_s11 }
  0x10   : > { %v139_v2 = vld [vmem:[%s134_s14] sm:$0x7] }
  0x11   : > { %144 = vperm.xlu0 %542, %v139_v2   ;;  %170 = vperm.xlu1 %544, %v139_v2  }
  0x15   : > { %543 = vset.pattern.permute.xlu0 %v581_v3  ;;  %545 = vset.pattern.permute.xlu1 %v579_v0 }
  0x16   : > { %159 = vperm.xlu0 %543, %v139_v2  }
  0x1a   : > { %547 = vset.pattern.permute.xlu0 %v580_v1 }
  0x90   : > { %v145_v5 = vpop.permute.xlu0 %144  ;;  %v171_v10 = vpop.permute.xlu1 %170 }
  0x91   : > { %v151_v6 = vmul.f32 %v641_v4, %v145_v5  ;;  %v177_v14 = vmul.f32 %v657_v9, %v171_v10  ;;  %v593_v10 = vmov 17  }
  0x93   : > { %v156_v12 = vadd.f32 %v647_v7, %v151_v6 }
  0x95   : > { %v160_v11 = vpop.permute.xlu0 %159 }
  0x96   : > { %v166_v13 = vmul.f32 %v652_v8, %v160_v11  ;;  %v594_v11 = vmov 26  }
  0x98   : > { %v167_v15 = vadd.f32 %v166_v13, %v156_v12 }
  0x9a   : > { %v178_v16 = vadd.f32 %v177_v14, %v167_v15 }
  0x9c   : > { %v179_v17 = vmax.f32 %v178_v16, 0.0 }
  0x9e   : > { %199 = vperm.xlu0 %547, %v179_v17   ;;  %183 = vperm.xlu1 %545, %v179_v17  }
  0xa2   : > { %550 = vset.pattern.permute.xlu0 %v582_v18  ;;  %546 = vset.pattern.permute.xlu1 %v581_v3 }
  0xa3   : > { %223 = vperm.xlu0 %550, %v179_v17   ;;  %193 = vperm.xlu1 %546, %v179_v17  }
  0xa7   : > { %548 = vset.pattern.permute.xlu1 %v583_v19  ;;  %553 = vset.pattern.permute.xlu0 %v585_v21  ;;  %v327_v21 = vlaneseq }
  0xa8   : > { %205 = vperm.xlu1 %548, %v179_v17  }
  0xac   : > { %549 = vset.pattern.permute.xlu1 %v584_v20  ;;  %v596_v20 = vmov 25  }
  0xad   : > { %212 = vperm.xlu1 %549, %v179_v17  }
  0xb1   : > { %551 = vset.pattern.permute.xlu1 %v586_v22 }
 0x11d   : > { %v184_v23 = vpop.permute.xlu1 %183  ;;  %v200_v29 = vpop.permute.xlu0 %199 }
 0x11e   : > { %v186_v24 = vmul.f32 %v641_v4, %v184_v23  ;;  %v202_v31 = vmul.f32 %v657_v9, %v200_v29 }
 0x120   : > { %v191_v27 = vadd.f32 %v501_v25, %v186_v24 }
 0x122   : > { %v194_v26 = vpop.permute.xlu1 %193  ;;  %v224_v37 = vpop.permute.xlu0 %223 }
 0x123   : > { %v196_v28 = vmul.f32 %v652_v8, %v194_v26  ;;  %v230_v41 = vmul.f32 %v503_v36, %v224_v37  ;;  %v689_v26 = vshrl.u32 %v327_v21, 7 }
 0x125   : > { %v197_v30 = vadd.f32 %v196_v28, %v191_v27  ;;  %vm366_vm0 = vcmp.eq.s32.totalorder %v689_v26, 1  ;;  %vm365_vm1 = vcmp.eq.s32.totalorder %v689_v26, 0 }
 0x127   : > { %v206_v32 = vpop.permute.xlu1 %205  ;;  %v203_v33 = vadd.f32 %v202_v31, %v197_v30 }
 0x128   : > { %v208_v34 = vmul.f32 %v647_v7, %v206_v32 }
 0x12a   : > { %v209_v39 = vadd.f32 %v208_v34, %v203_v33 }
 0x12c   : > { %v213_v38 = vpop.permute.xlu1 %212 }
 0x12d   : > { %v219_v40 = vmul.f32 %v502_v35, %v213_v38 }
 0x12f   : > { %v220_v42 = vadd.f32 %v219_v40, %v209_v39 }
 0x131   : > { %v231_v43 = vadd.f32 %v230_v41, %v220_v42 }
 0x133   : > { %v232_v44 = vmax.f32 %v231_v43, 0.0 }
 0x135   : > { %247 = vperm.xlu0 %553, %v232_v44   ;;  %235 = vperm.xlu1 %551, %v232_v44  }
 0x139   : > { %556 = vset.pattern.permute.xlu0 %v587_v45  ;;  %552 = vset.pattern.permute.xlu1 %v588_v46 }
 0x13a   : > { %265 = vperm.xlu0 %556, %v232_v44   ;;  %241 = vperm.xlu1 %552, %v232_v44  }
 0x13e   : > { %554 = vset.pattern.permute.xlu1 %v589_v47  ;;  %559 = vset.pattern.permute.xlu0 %v591_v49 }
 0x13f   : > { %253 = vperm.xlu1 %554, %v232_v44  }
 0x143   : > { %555 = vset.pattern.permute.xlu1 %v590_v48 }
 0x144   : > { %259 = vperm.xlu1 %555, %v232_v44  }
 0x148   : > { %557 = vset.pattern.permute.xlu1 %v592_v50 }
 0x1b4   : > { %v236_v51 = vpop.permute.xlu1 %235  ;;  %v248_v56 = vpop.permute.xlu0 %247 }
 0x1b5   : > { %v238_v52 = vmul.f32 %v641_v4, %v236_v51  ;;  %v250_v58 = vmul.f32 %v657_v9, %v248_v56 }
 0x1b7   : > { %v239_v54 = vadd.f32 %v501_v25, %v238_v52 }
 0x1b9   : > { %v242_v53 = vpop.permute.xlu1 %241  ;;  %v266_v62 = vpop.permute.xlu0 %265 }
 0x1ba   : > { %v244_v55 = vmul.f32 %v652_v8, %v242_v53  ;;  %v268_v2 = vmul.f32 %v503_v36, %v266_v62 }
 0x1bc   : > { %v245_v57 = vadd.f32 %v244_v55, %v239_v54 }
 0x1be   : > { %v254_v59 = vpop.permute.xlu1 %253  ;;  %v251_v60 = vadd.f32 %v250_v58, %v245_v57 }
 0x1bf   : > { %v256_v61 = vmul.f32 %v647_v7, %v254_v59  ;;  %v595_v7 = vmov 24  }
 0x1c1   : > { %v257_v0 = vadd.f32 %v256_v61, %v251_v60 }
 0x1c3   : > { %v260_v63 = vpop.permute.xlu1 %259 }
 0x1c4   : > { %v262_v1 = vmul.f32 %v502_v35, %v260_v63 }
 0x1c6   : > { %v263_v3 = vadd.f32 %v262_v1, %v257_v0 }
 0x1c8   : > { %v269_v5 = vadd.f32 %v268_v2, %v263_v3  ;;  %v405_v2 = vsub.s32 1, %v689_v26 }
 0x1ca   : > { %v679_v6 = vmax.f32 %v269_v5, 0.0 }
 0x1cc   : > { %284 = vperm.xlu0 %559, %v679_v6   ;;  %273 = vperm.xlu1 %557, %v679_v6  }
 0x1d0   : > { %558 = vset.pattern.permute.xlu1 %v593_v10  ;;  %562 = vset.pattern.permute.xlu0 %v594_v11  ;;  %v419_v11 = vsub.s32 2, %v689_v26 }
 0x1d1   : > { %278 = vperm.xlu1 %558, %v679_v6  }
 0x1d5   : > { %560 = vset.pattern.permute.xlu1 %v595_v7 }
 0x24b   : > { %v274_v12 = vpop.permute.xlu1 %273  ;;  %v285_v13 = vpop.permute.xlu0 %284 }
 0x24c   : > { %v276_v15 = vmul.f32 %v641_v4, %v274_v12  ;;  %v287_v17 = vmul.f32 %v657_v9, %v285_v13 }
 0x250   : > { %v279_v14 = vpop.permute.xlu1 %278 }
 0x251   : > { %v281_v16 = vmul.f32 %v652_v8, %v279_v14 }
 0x253   : > { %v282_v18 = vadd.f32 %v281_v16, %v276_v15 }
 0x255   : > { %v288_v19 = vadd.f32 %v287_v17, %v282_v18 }
 0x257   : > { %348 = vperm.xlu0 %562, %v288_v19   ;;  %316 = vperm.xlu1 %560, %v288_v19  }
 0x25b   : > { %561 = vset.pattern.permute.xlu1 %v596_v20  ;;  %295 = vrot.lane.b32.xlu0 %v652_v8, %s597_s29  ;;  %v692_v8 = vsub.s32 0, %v689_v26 }
 0x25c   : > { %332 = vperm.xlu1 %561, %v288_v19  }
 0x25f   : > { %305 = vrot.lane.b32.xlu0 %v657_v9, %s598_s30 }
 0x2d6   : > { %v349_v22 = vpop.permute.xlu0 %348  ;;  %v317_v23 = vpop.permute.xlu1 %316 }
 0x2d7   : > { %v351_v24 = vmul.f32 %v349_v22, %v288_v19  ;;  %v319_v25 = vmul.f32 %v317_v23, %v288_v19 }
 0x2d9   : > { %v353_v27 = vrot.slane %v351_v24, 1  ;;  %v321_v28 = vrot.slane %v319_v25, 1  ;;  %v356_v30 = vrot.slane %v351_v24, 2  ;;  %v324_v32 = vrot.slane %v319_v25, 2 }
 0x2da   : > { %v296_v57 = vpop.permute.xlu0 %295 }
 0x2db   : > { %v355_v29 = vadd.f32 %v353_v27, %v351_v24  ;;  %v323_v31 = vadd.f32 %v321_v28, %v319_v25  ;;  %v333_v33 = vpop.permute.xlu1 %332  ;;  %v298_v58 = vmul.f32 %v296_v57, %v679_v6 }
 0x2dc   : > { %v335_v34 = vmul.f32 %v333_v33, %v288_v19 }
 0x2dd   : > { %v358_v35 = vadd.f32 %v356_v30, %v355_v29  ;;  %v326_v9 = vadd.f32 %v324_v32, %v323_v31 }
 0x2de   : > { %v337_v36 = vrot.slane %v335_v34, 1  ;;  %v340_v38 = vrot.slane %v335_v34, 2  ;;  %v306_v59 = vpop.permute.xlu0 %305 }
 0x2df   : > { %v362_v39 = vrot.slane %v358_v35, %v692_v8  ;;  %v330_v40 = vrot.slane %v326_v9, %v692_v8  ;;  %v308_v60 = vmul.f32 %v306_v59, %v679_v6 }
 0x2e0   : > { %v339_v37 = vadd.f32 %v337_v36, %v335_v34 }
 0x2e1   : > { %v369_v43 = vsel %vm366_vm0, %v362_v39, %v330_v40 }
 0x2e2   : > { %v342_v41 = vadd.f32 %v340_v38, %v339_v37 }
 0x2e4   : > { %v346_v42 = vrot.slane %v342_v41, %v692_v8 }
 0x2e6   : > { %v367_v44 = vsel %vm366_vm0, %v346_v42, %v362_v39  ;;  %v370_v45 = vsel %vm365_vm1, %v346_v42, %v369_v43 }
 0x2e7   : > { %v368_v46 = vsel %vm365_vm1, %v330_v40, %v367_v44 }
 0x2e8   : > { %v372_v47 = vmax.f32 %v368_v46, %v370_v45  ;;  %v371_v48 = vmin.f32 %v368_v46, %v370_v45 }
 0x2ea   : > { %565 = vrcp.f32 %v372_v47  ;;  %vm373_vm3 = vcmp.ne.f32.partialorder %v372_v47, 0.0 }
 0x2f4   : > { %v566_v49 = vpop.eup %565 }
 0x2f5   : > { %v375_v50 = vmul.f32 %v566_v49, %v371_v48 }
 0x2f7   : > { %v376_v51 = vsel %vm373_vm3, %v375_v50, 0.0 }
 0x2f8   : > { %v378_v52 = vsel %vm377_vm2, %v376_v51, -inf }
 0x2f9   : > { %379 = vmax.xlane.f32.xlu1 %v378_v52 }
 0x386   : > { %v380_v53 = vpop.xlane.xlu1 %379 }
 0x387   : > { %v381_v54 = vsub.f32 %v376_v51, %v380_v53 }
 0x389   : > { %v382_v55 = vmul.f32 1.442695, %v381_v54 }
 0x38b   : > { %567 = vpow2.f32 %v382_v55 }
 0x395   : > { %v568_v56 = vpop.eup %567 }
 0x396   : > { %385 = vrot.lane.b32.xlu0 %v568_v56, %s599_s3 }
 0x39a   : > { %290 = vrot.lane.b32.xlu0 %v641_v4, %s600_s4 }
 0x39e   : > { %300 = vrot.lane.b32.xlu0 %v298_v58, %s601_s5 }
 0x3a2   : > { %310 = vrot.lane.b32.xlu0 %v308_v60, %s602_s6 }
 0x408   : > { %v386_v61 = vpop.permute.xlu0 %385 }
 0x409   : > { %v389_v62 = vsel %vm388_vm4, %v386_v61, 0.0 }
 0x40a   : > { %390 = vadd.xlane.f32.xlu0 %v389_v62 }
 0x40c   : > { %v291_v63 = vpop.permute.xlu0 %290 }
 0x40d   : > { %v293_v1 = vmul.f32 %v291_v63, %v679_v6  ;;  %v606_v6 = vmov 32  }
 0x40e   : > { %563 = vset.pattern.permute.xlu1 %v606_v6  ;;  %564 = vset.pattern.permute.xlu0 %v606_v6 }
 0x410   : > { %v301_v0 = vpop.permute.xlu0 %300 }
 0x411   : > { %v303_v4 = vadd.f32 %v301_v0, %v293_v1 }
 0x414   : > { %v311_v3 = vpop.permute.xlu0 %310 }
 0x415   : > { %v313_v5 = vadd.f32 %v311_v3, %v303_v4 }
 0x417   : > { %v406_v10 = vrot.slane %v313_v5, %v405_v2  ;;  %v420_v7 = vrot.slane %v313_v5, %v419_v11  ;;  %v397_v12 = vrot.slane %v313_v5, %v692_v8 }
 0x419   : > { %408 = vrot.lane.b32.xlu1 %v406_v10, %s603_s7 }
 0x41d   : > { %422 = vrot.lane.b32.xlu1 %v420_v7, %s604_s8 }
 0x421   : > { %399 = vrot.lane.b32.xlu1 %v397_v12, %s605_s12 }
 0x48b   : > { %v409_v14 = vpop.permute.xlu1 %408 }
 0x48f   : > { %v423_v17 = vpop.permute.xlu1 %422 }
 0x493   : > { %v400_v20 = vpop.permute.xlu1 %399 }
 0x497   : > { %v391_v13 = vpop.xlane.xlu0 %390 }
 0x498   : > { %569 = vrcp.f32 %v391_v13 }
 0x4a2   : > { %v570_v15 = vpop.eup %569 }
 0x4a3   : > { %v393_v16 = vmul.f32 %v570_v15, %v568_v56 }
 0x4a5   : > { %v425_v18 = vmul.f32 %v423_v17, %v393_v16  ;;  %v411_v19 = vmul.f32 %v409_v14, %v393_v16  ;;  %v402_v21 = vmul.f32 %v400_v20, %v393_v16 }
 0x4a7   : > { %427 = vrot.lane.b32.xlu0 %v425_v18, %s602_s6  ;;  %413 = vrot.lane.b32.xlu1 %v411_v19, %s601_s5 }
 0x519   : > { %v414_v22 = vpop.permute.xlu1 %413  ;;  %v428_v24 = vpop.permute.xlu0 %427 }
 0x51a   : > { %v416_v23 = vadd.f32 %v414_v22, %v402_v21 }
 0x51c   : > { %v430_v25 = vadd.f32 %v428_v24, %v416_v23 }
 0x51e   : > { %433 = vperm.xlu1 %563, %v430_v25  }
 0x59d   : > { %v434_v26 = vpop.permute.xlu1 %433 }
 0x59e   : > { %436 = vst [vmem:[%s138_s15] sm:$0x7] %v434_v26 }
 0x59f PF: > { %s12_s9 = sadd.s32 1, %s577_s9  }
 0x5a0   : > { %p9_p4 = scmp.ge.s32.totalorder %s12_s9, 6  }
 0x5a2   :  { %11 = sbr.rel (!%p9_p4) target bundleno = 1 (0x1), region = 58 }

</bundles_post_ra>
